<compile_context>
chip_gen: v7x
topology: tpu7x:2x2x1
jax: 0.10.0
libtpu: 0.0.40
codegen_flags: <defaults>
</compile_context>

<pallas_src>
import functools

import jax
import jax.numpy as jnp
from jax.experimental import pallas as pl
from jax.experimental.pallas import tpu as pltpu

_LANES = 128


def _lmse_kernel(a_ref, b_ref, out_ref, acc_ref, *, inv_n):
    # a_ref, b_ref: (block_rows, 128) tiles of the flattened inputs
    # out_ref:      (1, 1) final loss
    # acc_ref:      (1, 1) VMEM accumulator, persistent across the grid
    i = pl.program_id(0)

    @pl.when(i == 0)
    def _():
        acc_ref[...] = jnp.zeros_like(acc_ref)

    d = jnp.log(a_ref[...]) - jnp.log(b_ref[...])
    acc_ref[...] += jnp.sum(d * d, keepdims=True)          # (1, 1) partial sum

    @pl.when(i == pl.num_programs(0) - 1)
    def _():
        out_ref[...] = acc_ref[...] * inv_n                 # single final store


def lmse_loss(a, b, *, block_rows=512):
    """mean((log(a) - log(b))**2) over all elements, computed in one Pallas kernel."""
    a = a.astype(jnp.float32).reshape(-1)
    b = b.astype(jnp.float32).reshape(-1)
    n = a.shape[0]

    rows = pl.cdiv(n, _LANES)
    rows = pl.cdiv(rows, 8) * 8                              # sublane-align rows
    block_rows = max(8, min(block_rows, rows))
    block_rows = (block_rows // 8) * 8                       # (8,128)-tileable block
    grid = pl.cdiv(rows, block_rows)
    total = grid * block_rows * _LANES

    pad = total - n
    # Pad with 1.0 in both operands: log(1) - log(1) = 0 -> no effect on the sum.
    a2 = jnp.pad(a, (0, pad), constant_values=1.0).reshape(grid * block_rows, _LANES)
    b2 = jnp.pad(b, (0, pad), constant_values=1.0).reshape(grid * block_rows, _LANES)

    out = pl.pallas_call(
        functools.partial(_lmse_kernel, inv_n=1.0 / n),
        out_shape=jax.ShapeDtypeStruct((1, 1), jnp.float32),
        grid=(grid,),
        in_specs=[pl.BlockSpec((block_rows, _LANES), lambda i: (i, 0))] * 2,
        out_specs=pl.BlockSpec((1, 1), lambda i: (0, 0)),
        scratch_shapes=[pltpu.VMEM((1, 1), jnp.float32)],
        compiler_params=pltpu.CompilerParams(dimension_semantics=("arbitrary",)),
    )(a2, b2)
    return out[0, 0]


def reference_lmse(a, b):
    """Pure-JAX reference of the PyTorch forward, for a correctness check."""
    return jnp.mean((jnp.log(a) - jnp.log(b)) ** 2)


if __name__ == "__main__":
    key = jax.random.PRNGKey(0)
    k_a, k_b = jax.random.split(key)
    shape = (2, 4, 16, 16)  # 2048 elements -> (16, 128) lane-dense layout

    # Strictly positive inputs, as torch.log in the module requires.
    a = jax.random.uniform(k_a, shape, jnp.float32, minval=0.1, maxval=3.0)
    b = jax.random.uniform(k_b, shape, jnp.float32, minval=0.1, maxval=3.0)

    # block_rows=8 -> grid of 2 steps, exercising the init/accumulate/finalize path.
    loss = lmse_loss(a, b, block_rows=8)
    jax.block_until_ready(loss)

    ref = reference_lmse(a, b)
    assert loss.shape == ()
    assert jnp.allclose(loss, ref, atol=1e-5, rtol=1e-5), (loss, ref)

    print("KERNEL_OK")
</pallas_src>

<mosaic_0001>
module attributes {stable_mosaic.version = 11 : i64} {
  func.func @_lmse_kernel(%arg0: i32, %arg1: memref<8x128xf32, #tpu.memory_space<vmem>>, %arg2: memref<8x128xf32, #tpu.memory_space<vmem>>, %arg3: memref<1x1xf32, #tpu.memory_space<vmem>>, %arg4: memref<1x1xf32, #tpu.memory_space<vmem>>) attributes {dimension_semantics = [#tpu.dimension_semantics<arbitrary>], iteration_bounds = array<i64: 2>, scalar_prefetch = 0 : i64, scratch_operands = 1 : i64, tpu.core_type = #tpu.core_type<tc>, window_params = [{transform_indices = @transform_0, window_bounds = array<i64: 8, 128>}, {transform_indices = @transform_1, window_bounds = array<i64: 8, 128>}, {pipeline_mode = #tpu.pipeline_mode<synchronous>, transform_indices = @transform_2, window_bounds = array<i64: 1, 1>}]} {
    %c0_i32 = arith.constant 0 : i32
    %0 = arith.cmpi eq, %arg0, %c0_i32 : i32
    %1 = arith.extui %0 : i1 to i32
    %c0_i32_0 = arith.constant 0 : i32
    %2 = arith.cmpi ne, %1, %c0_i32_0 : i32
    scf.if %2 {
      %cst_9 = arith.constant 0.000000e+00 : f32
      %20 = vector.broadcast %cst_9 : f32 to vector<1x1xf32>
      %c0_10 = arith.constant 0 : index
      %c0_11 = arith.constant 0 : index
      %21 = vector.load %arg4[%c0_10, %c0_11] : memref<1x1xf32, #tpu.memory_space<vmem>>, vector<1x1xf32>
      tpu.vector_store %arg4[%c0_10, %c0_11], %20 {strides = array<i32>} : memref<1x1xf32, #tpu.memory_space<vmem>>, vector<1x1xf32>,
    } else {
    }
    %c0 = arith.constant 0 : index
    %c0_1 = arith.constant 0 : index
    %3 = vector.load %arg1[%c0, %c0_1] : memref<8x128xf32, #tpu.memory_space<vmem>>, vector<8x128xf32>
    %4 = math.log %3 : vector<8x128xf32>
    %c0_2 = arith.constant 0 : index
    %c0_3 = arith.constant 0 : index
    %5 = vector.load %arg2[%c0_2, %c0_3] : memref<8x128xf32, #tpu.memory_space<vmem>>, vector<8x128xf32>
    %6 = math.log %5 : vector<8x128xf32>
    %7 = arith.subf %4, %6 : vector<8x128xf32>
    %c0_4 = arith.constant 0 : index
    %c0_5 = arith.constant 0 : index
    %8 = vector.load %arg4[%c0_4, %c0_5] : memref<1x1xf32, #tpu.memory_space<vmem>>, vector<1x1xf32>
    %9 = arith.mulf %7, %7 : vector<8x128xf32>
    %10 = vector.shape_cast %9 : vector<8x128xf32> to vector<1x8x128xf32>
    %cst = arith.constant dense<0.000000e+00> : vector<1xf32>
    %11 = vector.multi_reduction <add>, %10, %cst [1, 2] : vector<1x8x128xf32> to vector<1xf32>
    %12 = vector.shape_cast %11 : vector<1xf32> to vector<1x1x1xf32>
    %13 = vector.extract %12[0, 0, 0] : f32 from vector<1x1x1xf32>
    %14 = vector.broadcast %13 : f32 to vector<1x1xf32>
    %15 = arith.addf %8, %14 : vector<1x1xf32>
    %c0_6 = arith.constant 0 : index
    %c0_7 = arith.constant 0 : index
    %16 = vector.load %arg4[%c0_6, %c0_7] : memref<1x1xf32, #tpu.memory_space<vmem>>, vector<1x1xf32>
    tpu.vector_store %arg4[%c0_6, %c0_7], %15 {strides = array<i32>} : memref<1x1xf32, #tpu.memory_space<vmem>>, vector<1x1xf32>,
    %c1_i32 = arith.constant 1 : i32
    %17 = arith.cmpi eq, %arg0, %c1_i32 : i32
    %18 = arith.extui %17 : i1 to i32
    %c0_i32_8 = arith.constant 0 : i32
    %19 = arith.cmpi ne, %18, %c0_i32_8 : i32
    scf.if %19 {
      %c0_9 = arith.constant 0 : index
      %c0_10 = arith.constant 0 : index
      %20 = vector.load %arg4[%c0_9, %c0_10] : memref<1x1xf32, #tpu.memory_space<vmem>>, vector<1x1xf32>
      %cst_11 = arith.constant 4.8828125E-4 : f32
      %21 = vector.broadcast %cst_11 : f32 to vector<1x1xf32>
      %22 = arith.mulf %20, %21 : vector<1x1xf32>
      %c0_12 = arith.constant 0 : index
      %c0_13 = arith.constant 0 : index
      %23 = vector.load %arg3[%c0_12, %c0_13] : memref<1x1xf32, #tpu.memory_space<vmem>>, vector<1x1xf32>
      tpu.vector_store %arg3[%c0_12, %c0_13], %22 {strides = array<i32>} : memref<1x1xf32, #tpu.memory_space<vmem>>, vector<1x1xf32>,
    } else {
    }
    return
  }
  func.func @transform_0(%arg0: i32) -> (i32, i32) {
    %c0_i32 = arith.constant 0 : i32
    %c0_i32_0 = arith.constant 0 : i32
    return %arg0, %c0_i32 : i32, i32
  }
  func.func @transform_1(%arg0: i32) -> (i32, i32) {
    %c0_i32 = arith.constant 0 : i32
    %c0_i32_0 = arith.constant 0 : i32
    return %arg0, %c0_i32 : i32, i32
  }
  func.func @transform_2(%arg0: i32) -> (i32, i32) {
    %c0_i32 = arith.constant 0 : i32
    %c0_i32_0 = arith.constant 0 : i32
    %c0_i32_1 = arith.constant 0 : i32
    return %c0_i32, %c0_i32_0 : i32, i32
  }
}

</mosaic_0001>

<bundles_post_ra>
// kernel: tpu_custom_call.1
= control target key start
LH: loop header
LB: loop body
LE: loop exit
PB: predicated region body
PF: predicated region fallthrough
CT: control target
= control target key end

     0   :  { %7 = vsyncpa [#allocation4], 0  ;;  %s696_s0 = inlined_call_operand.hbm [shape: f32[16,128], index: 0, kind: input, shape index: {}]   ;;  %s697_s1 = inlined_call_operand.hbm [shape: f32[16,128], index: 1, kind: input, shape index: {}]   ;;  %s698_s2 = inlined_call_operand.hbm [shape: f32[1,1], index: 2, kind: output, shape index: {}]  }
   0x1   :  { %9 = vsyncpa [#allocation4 + $0x1], 0 }
   0x2   :  { %10 = vsyncpa [#allocation7], 0 }
   0x3   :  { %12 = vsyncpa [#allocation7 + $0x1], 0 }
   0x4   :  { %13 = vsyncpa [#allocation5], 0  ;;  %s522_s9 = smov 0   ;;  %s524_s10 = smov 0  }
   0x5   :  { %s526_s11 = smov 0   ;;  %s528_s12 = smov 0  }
   0x6 LB: > { %s541_s13 = sadd.s32 4294967295, %s501_s12   ;;  %s544_s14 = sadd.s32 1, %s501_s12   ;;  %s501_s12 = sphi %s528_s12, %s710_s12   ;;  %s497_s11 = sphi %s526_s11, %s709_s11   ;;  %s493_s10 = sphi %s524_s10, %s708_s10   ;;  %s489_s9 = sphi %s522_s9, %s707_s9  }
   0x7   : > { %s23_s15 = ssub.s32 %s501_s12, %s544_s14  ;;  %s26_s16 = sadd.s32 1, %s497_s11 }
   0x8   : > { %p24_p0 = scmp.eq.s32.totalorder %s23_s15, 0  ;;  %p33_p1 = scmp.ne.s32.totalorder %s497_s11, %s493_s10 }
   0x9   : > { %p34_p2 = scmp.eq.s32.totalorder %s501_s12, 0  ;;  %p39_p3 = scmp.ne.s32.totalorder %s493_s10, %s489_s9 }
   0xa   : > { %s554_s17 = scalar_select %p24_p0, %s497_s11, %s26_s16  }
   0xb   : > { %p35_p4 = por %p34_p2, %p33_p1  ;;  %p40_p5 = scmp.eq.s32.totalorder %s541_s13, 0 }
   0xc   : > { %p332_p6 = scmp.lt.s32.totalorder %s501_s12, 2  ;;  %s563_s19 = sand.u32 1, %s497_s11  }
   0xd   : > { %p558_p7 = por %p40_p5, %p39_p3  ;;  %s302_s20 = sshll.u32 %s563_s19, 3 }
   0xe   : > { %s303_s21 = sshll.u32 %s501_s12, 7  ;;  %s114_s25 = scalar_lea.vmem [#allocation3], %s302_s20 }
   0xf   : > { %s700_s18 = scalar_select %p558_p7, 1, 0 }
  0x10   : > { %s572_s24 = scalar_lea.hbm %s696_s0, %s303_s21  ;;  %s121_s26 = sshll.u32 %s114_s25, 4  ;;  %s576_s26 = int_to_ptr.vmem [resolvable:$true] %s121_s26 }
  0x11   : > { %p578_p8 = pnand %p332_p6, %p35_p4  ;;  %s111_s28 = scalar_lea.sflag [#allocation4], %s563_s19 }
  0x12   : > { %s373_s29 = scalar_lea.hbm %s572_s24, 128  ;;  %s378_s4 = scalar_lea.hbm %s696_s0, 256 }
  0x13   : > { %p374_p11 = scmp.ne.s32.totalorder %s572_s24, %s373_s29  ;;  %p375_p12 = pneg %p578_p8 }
  0x14   : > { %p379_p1 = scmp.lt.u32.totalorder %s572_s24, %s696_s0  ;;  %p380_p2 = scmp.lt.u32.totalorder %s378_s4, %s373_s29 }
  0x15   : > { %p376_p13 = pnand %p375_p12, %p374_p11  ;;  %p382_p4 = scmp.lt.u32.totalorder %s373_s29, %s572_s24 }
  0x16   : > { %p381_p3 = por %p380_p2, %p379_p1 }
  0x17   : > { %p377_p0 = pneg %p376_p13 }
  0x18   : > { %p383_p5 = por %p382_p4, %p381_p3 }
  0x1a   : > { %p384_p6 = pnand %p383_p5, %p377_p0 }
  0x1c   : > { %387 = shalt.err (!%p384_p6)
}
  0x1d   : > { %s388_s7 = scalar_lea.vmem %s576_s26, 128  ;;  %s503_s8 = smov [#allocation3]  }
  0x1e   : > { %p389_p11 = scmp.ne.s32.totalorder %s576_s26, %s388_s7  ;;  %s393_s9 = sshll.u32 %s503_s8, 4  ;;  %s394_s9 = int_to_ptr.vmem [resolvable:$false] %s393_s9 }
  0x1f   : > { %s395_s15 = scalar_lea.vmem %s394_s9, 256  ;;  %p396_p10 = scmp.lt.s32.totalorder %s576_s26, %s394_s9 }
  0x20   : > { %p391_p13 = pnand %p389_p11, %p375_p12  ;;  %p397_p1 = scmp.lt.s32.totalorder %s395_s15, %s388_s7 }
  0x22   : > { %p392_p9 = pneg %p391_p13  ;;  %p398_p2 = por %p397_p1, %p396_p10 }
  0x24   : > { %p399_p3 = pnand %p398_p2, %p392_p9 }
  0x26   : > { %402 = shalt.err (!%p399_p3)
}
  0x27   : > { %328 = dma.hbm_to_vmem [thread:$0]  (!%p578_p8), %s572_s24, 128, %s576_s26, %s111_s28  }
  0x28   : > { %p702_p0 = scmp.lt.s32.totalorder %s501_s12, 3  ;;  %p703_p4 = scmp.ge.s32.totalorder %s501_s12, 1 }
  0x29   : > { %s623_s25 = scalar_lea.hbm %s697_s1, %s303_s21  ;;  %s132_s29 = scalar_lea.vmem [#allocation6], %s302_s20 }
  0x2a   : > { %p614_p5 = pnand %p703_p4, %p702_p0  ;;  %s139_s30 = sshll.u32 %s132_s29, 4  ;;  %s140_s30 = int_to_ptr.vmem [resolvable:$true] %s139_s30 }
  0x2b   : > { %s129_s24 = scalar_lea.sflag [#allocation7], %s563_s19  ;;  %s403_s26 = scalar_lea.hbm %s623_s25, 128 }
  0x2c   : > { %s704_s16 = scalar_select %p614_p5, 1, 0 }
  0x2d   : > { %p404_p9 = scmp.ne.s32.totalorder %s623_s25, %s403_s26  ;;  %s408_s21 = scalar_lea.hbm %s697_s1, 256 }
  0x2e   : > { %p409_p11 = scmp.lt.u32.totalorder %s623_s25, %s697_s1  ;;  %p410_p13 = scmp.lt.u32.totalorder %s408_s21, %s403_s26 }
  0x2f   : > { %p406_p10 = pnand %p404_p9, %p375_p12  ;;  %p412_p2 = scmp.lt.u32.totalorder %s403_s26, %s623_s25 }
  0x30   : > { %p411_p1 = por %p410_p13, %p409_p11 }
  0x31   : > { %p407_p6 = pneg %p406_p10 }
  0x32   : > { %p413_p3 = por %p412_p2, %p411_p1 }
  0x34   : > { %p414_p0 = pnand %p413_p3, %p407_p6 }
  0x36   : > { %417 = shalt.err (!%p414_p0)
}
  0x37   : > { %s418_s19 = scalar_lea.vmem %s140_s30, 128  ;;  %s504_s20 = smov [#allocation6]  }
  0x38   : > { %p419_p4 = scmp.ne.s32.totalorder %s140_s30, %s418_s19  ;;  %s423_s5 = sshll.u32 %s504_s20, 4  ;;  %s424_s5 = int_to_ptr.vmem [resolvable:$false] %s423_s5 }
  0x39   : > { %s425_s6 = scalar_lea.vmem %s424_s5, 256  ;;  %p426_p7 = scmp.lt.s32.totalorder %s140_s30, %s424_s5 }
  0x3a   : > { %p421_p9 = pnand %p419_p4, %p375_p12  ;;  %p427_p5 = scmp.lt.s32.totalorder %s425_s6, %s418_s19 }
  0x3c   : > { %p422_p10 = pneg %p421_p9  ;;  %p428_p11 = por %p427_p5, %p426_p7 }
  0x3e   : > { %p429_p13 = pnand %p428_p11, %p422_p10 }
  0x40   : > { %432 = shalt.err (!%p429_p13)
}
  0x41   : > { %331 = dma.hbm_to_vmem [thread:$0]  (!%p578_p8), %s623_s25, 128, %s140_s30, %s129_s24  }
  0x42   : > { %p705_p6 = scmp.ne.s32.totalorder %s704_s16, 0 }
  0x43   : > { %s150_s7 = sand.u32 (!%p705_p6), 1, %s493_s10   ;;  %p706_p12 = scmp.ne.s32.totalorder (!%p705_p6), %s700_s18, 0 }
  0x44   : > { %148 = sbr.rel (%p705_p6) target bundleno = 349 (0x15d), region = 28  ;;  %s307_s8 = sshll.u32 (!%p705_p6), %s150_s7, 3 }
  0x45   : > { %s151_s9 = scalar_lea.sflag (!%p705_p6), [#allocation4], %s150_s7  ;;  %s154_s15 = scalar_lea.vmem (!%p705_p6), [#allocation3], %s307_s8 }
  0x4b   : > { %476 = dma.done.wait (%p706_p12), %s151_s9, 128  }
  0x4c   : > { %478 = vsyncadd (%p706_p12), %s151_s9, 4294967168  ;;  %s160_s22 = scalar_lea.sflag [#allocation7], %s150_s7  ;;  %s163_s23 = scalar_lea.vmem [#allocation6], %s307_s8 }
  0x4d   : > { %480 = dma.done.wait (%p706_p12), %s160_s22, 128  }
  0x4e   : > { %482 = vsyncadd (%p706_p12), %s160_s22, 4294967168  ;;  %p309_p7 = scmp.ne.s32.totalorder %s541_s13, 0 }
  0x4f   : > { %vm188_vm0 = vcmask (!%p309_p7), 0   ;;  %v505_v0 = vmov (!%p309_p7), 0.0  }
  0x50   : > { %187 = sbr.rel (%p309_p7) target bundleno = 87 (0x57), region = 40  ;;  %189 = vst.msk [vmem:[#allocation2] sm:$0x1] (!%p309_p7), %vm188_vm0, %v505_v0 }
  0x57 PF: > { %v190_v1 = vld [vmem:[%s154_s15] sm:$0xff]  ;;  %v193_v2 = vld [vmem:[%s163_s23] sm:$0xff]  ;;  %vm210_vm1 = vcmask 0   ;;  %p310_p8 = scmp.ne.s32.totalorder %s541_s13, 1 }
  0x58   : > { %369 = vlog2.f32 %v190_v1  ;;  %v197_v16 = vld [vmem:[#allocation2] sm:$0x1] }
  0x59   : > { %371 = vlog2.f32 %v193_v2 }
  0x62   : > { %v370_v3 = vpop.eup %369 }
  0x63   : > { %v372_v4 = vpop.eup %371  ;;  %v192_v5 = vmul.f32 0.6931472, %v370_v3 }
  0x64   : > { %v195_v6 = vmul.f32 0.6931472, %v372_v4 }
  0x66   : > { %v196_v7 = vsub.f32 %v192_v5, %v195_v6 }
  0x68   : > { %v198_v8 = vmul.f32 %v196_v7, %v196_v7 }
  0x6a   : > { %199 = vadd.xlane.f32.xlu0 %v198_v8 }
  0xf7   : > { %v200_v9 = vpop.xlane.xlu0 %199 }
  0xf8   : > { %v201_v10 = vrot.slane %v200_v9, 4 }
  0xfa   : > { %v202_v11 = vadd.f32 %v201_v10, %v200_v9 }
  0xfc   : > { %v203_v12 = vrot.slane %v202_v11, 2 }
  0xfe   : > { %v204_v13 = vadd.f32 %v203_v12, %v202_v11 }
 0x100   : > { %v205_v14 = vrot.slane %v204_v13, 1 }
 0x102   : > { %v206_v15 = vadd.f32 %v205_v14, %v204_v13 }
 0x104   : > { %315 = vpush %v206_v15 }
 0x133   : > { %215 = sbr.rel (%p310_p8) target bundleno = 324 (0x144), region = 44 }
 0x135   : > { %s316_s18 = spop %315 }
 0x136   : > { %v208_v17 = vstv %s316_s18 }
 0x137   : > { %v209_v18 = vadd.f32 %v208_v17, %v197_v16 }
 0x139   : > { %211 = vst.msk [vmem:[#allocation2] sm:$0x1] %vm210_vm1, %v209_v18 }
 0x140   : > { %v216_v19 = vld [vmem:[#allocation2] sm:$0x1] }
 0x141   : > { %v217_v20 = vmul.f32 0.00048828125, %v216_v19 }
 0x143   : > { %218 = vst.msk [vmem:[#allocation8] sm:$0x1] %vm210_vm1, %v217_v20 }
 0x144 PF: > { %p333_p5 = scmp.eq.s32.totalorder %s541_s13, 1  ;;  %s506_s27 = smov [#allocation8]  }
 0x145   : > { %s226_s16 = sshll.u32 %s506_s27, 4  ;;  %s227_s16 = int_to_ptr.vmem [resolvable:$true] %s226_s16 }
 0x146   : > { %s433_s25 = scalar_lea.vmem %s227_s16, 16  ;;  %s439_s29 = scalar_lea.vmem %s227_s16, 32 }
 0x147   : > { %p434_p1 = scmp.ne.s32.totalorder %s227_s16, %s433_s25  ;;  %p440_p0 = scmp.lt.s32.totalorder %s227_s16, %s227_s16 }
 0x148   : > { %p441_p4 = scmp.lt.s32.totalorder %s439_s29, %s433_s25 }
 0x149   : > { %p435_p2 = pnand %p434_p1, %p333_p5 }
 0x14a   : > { %p442_p9 = por %p441_p4, %p440_p0 }
 0x14b   : > { %p436_p3 = pneg %p435_p2 }
 0x14d   : > { %p443_p10 = pnand %p442_p9, %p436_p3 }
 0x14f   : > { %446 = shalt.err (!%p443_p10)
}
 0x150   : > { %s447_s26 = scalar_lea.hbm %s698_s2, 16 }
 0x151   : > { %p448_p11 = scmp.ne.s32.totalorder %s698_s2, %s447_s26  ;;  %p453_p12 = scmp.lt.u32.totalorder %s447_s26, %s698_s2 }
 0x153   : > { %p449_p13 = pnand %p448_p11, %p333_p5 }
 0x155   : > { %p450_p6 = pneg %p449_p13 }
 0x157   : > { %p455_p7 = pnand %p453_p12, %p450_p6 }
 0x159   : > { %458 = shalt.err (!%p455_p7)
}
 0x15a   : > { %322 = dma.vmem_to_hbm [thread:$0]  (%p333_p5), %s227_s16, 16, %s698_s2, [#allocation5]  }
 0x15b   : > { %484 = dma.done.wait (%p333_p5), [#allocation5], 16  }
 0x15c   : > { %486 = vsyncadd (%p333_p5), [#allocation5], 4294967280 }
 0x15d PF: > { %p16_p8 = scmp.ge.s32.totalorder %s544_s14, 4   ;;  %s707_s9 = smov %s493_s10 }
 0x15e   : > { %s708_s10 = smov %s497_s11  ;;  %s709_s11 = smov %s554_s17 }
 0x15f   : > { %s710_s12 = smov %s544_s14  ;;  %18 = sbr.rel (!%p16_p8) target bundleno = 6 (0x6), region = 86 }
 0x166   :  { %239 = vsyncpa [#allocation4], 1 }
 0x167   :  { %241 = vsyncpa [#allocation4 + $0x1], 1 }
 0x168   :  { %242 = vsyncpa [#allocation7], 1 }
 0x169   :  { %244 = vsyncpa [#allocation7 + $0x1], 1 }
 0x16a   :  { %245 = vsyncpa [#allocation5], 1 }
 0x16b   :  { %247 = vsyncpa [#allocation5 + $0x1], 1 }

</bundles_post_ra>
